<compile_context>
chip_gen: v7x
topology: tpu7x:2x2x1
jax: 0.10.0
libtpu: 0.0.40
codegen_flags: <defaults>
</compile_context>

<pallas_src>
import jax
import jax.numpy as jnp
from jax.experimental import pallas as pl
from jax.experimental.pallas import tpu as pltpu

HIDDEN = 16                    # hidden_size in the PyTorch module
PACK = 128 // HIDDEN           # logical rows packed per lane-dense row (= 8)
LANES = PACK * HIDDEN          # = 128, lane-dense width
ALIGN_ROWS = 8 * PACK          # = 64 logical rows -> packed rows multiple of 8
MAX_TILE_R = 4096              # packed rows per grid step: (4096,128) f32 = 2 MiB


def _round_up(x, m):
    return ((x + m - 1) // m) * m


def _cdiv(a, b):
    return -(-a // b)


def prepack_params(weight, bias):
    """One-time parameter prepack (done at init time, not per call).

    weight: (HIDDEN, HIDDEN) in nn.Linear convention [out, in]
    bias:   (HIDDEN,)

    Returns:
      w_packed: (128, 128) block-diagonal matrix with W.T repeated on the
                diagonal, so (packed_rows, 128) @ w_packed applies the linear
                layer independently to each 16-lane group (no row mixing).
      b_packed: (1, 128) bias tiled PACK times.
    """
    wt = weight.T  # (in, out)
    w_packed = jnp.kron(jnp.eye(PACK, dtype=weight.dtype), wt)   # (128, 128)
    b_packed = jnp.tile(bias, (PACK,)).reshape(1, LANES)         # (1, 128)
    return w_packed, b_packed


def _packed_linear_kernel(x_ref, w_ref, b_ref, o_ref):
    # x_ref : (tile_r, 128)  VMEM   lane-dense packed activations
    # w_ref : (128, 128)     VMEM   block-diagonal weight (resident)
    # b_ref : (1, 128)       VMEM   tiled bias (resident)
    # o_ref : (tile_r, 128)  VMEM   lane-dense packed output
    acc = jnp.dot(
        x_ref[...], w_ref[...],
        preferred_element_type=jnp.float32,
        precision=jax.lax.Precision.HIGHEST,   # true f32 parity with nn.Linear
    )
    o_ref[...] = (acc + b_ref[...]).astype(o_ref.dtype)


@jax.jit
def my_layer_forward(x, w_packed, b_packed):
    """Equivalent of MyLayer.forward: y = x @ weight.T + bias.

    x:        (..., HIDDEN) float32
    w_packed: (128, 128) float32   from prepack_params
    b_packed: (1, 128)   float32   from prepack_params
    """
    orig_shape = x.shape
    rows = 1
    for d in orig_shape[:-1]:
        rows *= d
    rows = max(rows, 1)
    x2d = x.reshape(rows, HIDDEN)

    # Pad (only when needed) to a multiple of 64 logical rows so the packed
    # row count is a sublane-aligned multiple of 8.  When rows % 64 == 0 this
    # path is a pure metadata reshape: no pad, no slice, no extra HBM pass.
    padded_rows = _round_up(rows, ALIGN_ROWS)
    needs_pad = padded_rows != rows
    if needs_pad:
        x2d = jnp.pad(x2d, ((0, padded_rows - rows), (0, 0)))

    packed_rows = padded_rows // PACK          # multiple of 8, >= 8
    xpk = x2d.reshape(packed_rows, LANES)      # contiguous -> free reshape

    # Tile as large as possible (amortize per-step overhead) while keeping
    # >=2 grid steps for medium/large inputs (v7x megacore sharding).
    tile_r = max(8, min(MAX_TILE_R, _round_up(_cdiv(packed_rows, 2), 8)))
    grid = (_cdiv(packed_rows, tile_r),)       # ragged last block -> masked

    out_pk = pl.pallas_call(
        _packed_linear_kernel,
        out_shape=jax.ShapeDtypeStruct((packed_rows, LANES), x.dtype),
        grid_spec=pltpu.PrefetchScalarGridSpec(
            num_scalar_prefetch=0,
            grid=grid,
            in_specs=[
                pl.BlockSpec((tile_r, LANES), lambda i: (i, 0)),   # activations
                pl.BlockSpec((LANES, LANES), lambda i: (0, 0)),    # weight (resident)
                pl.BlockSpec((1, LANES), lambda i: (0, 0)),        # bias (resident)
            ],
            out_specs=pl.BlockSpec((tile_r, LANES), lambda i: (i, 0)),
        ),
        compiler_params=pltpu.CompilerParams(
            dimension_semantics=("parallel",),
            vmem_limit_bytes=32 * 1024 * 1024,   # headroom for 2 MiB blocks, all gens
        ),
    )(xpk, w_packed, b_packed)

    out2d = out_pk.reshape(padded_rows, HIDDEN)
    if needs_pad:
        out2d = out2d[:rows]
    return out2d.reshape(orig_shape)


if __name__ == "__main__":
    key = jax.random.PRNGKey(0)
    kx, kw, kb, kx2, kx3 = jax.random.split(key, 5)

    # Deterministic parameter init (nn.Linear shapes: W [out,in], b [out]).
    bound = 1.0 / jnp.sqrt(HIDDEN)
    weight = jax.random.uniform(kw, (HIDDEN, HIDDEN), jnp.float32, -bound, bound)
    bias = jax.random.uniform(kb, (HIDDEN,), jnp.float32, -bound, bound)

    # One-time prepack.
    w_packed, b_packed = prepack_params(weight, bias)

    def ref_fn(xx):
        return jnp.matmul(xx, weight.T, precision=jax.lax.Precision.HIGHEST) + bias

    # (batch=2, seq=8, hidden=16): rows=16 -> small padded path, single step.
    x = jax.random.normal(kx, (2, 8, HIDDEN), dtype=jnp.float32)
    y = my_layer_forward(x, w_packed, b_packed)
    jax.block_until_ready(y)
    assert y.shape == x.shape
    assert jnp.allclose(y, ref_fn(x), atol=1e-5, rtol=1e-5)

    # Ragged rows (3*5 = 15, not a multiple of PACK).
    x2 = jax.random.normal(kx2, (3, 5, HIDDEN), dtype=jnp.float32)
    y2 = my_layer_forward(x2, w_packed, b_packed)
    jax.block_until_ready(y2)
    assert y2.shape == x2.shape
    assert jnp.allclose(y2, ref_fn(x2), atol=1e-5, rtol=1e-5)

    # Aligned fast path (rows = 128, multiple of 64): no pad / no slice,
    # two grid steps (exercises the parallel axis).
    x3 = jax.random.normal(kx3, (2, 64, HIDDEN), dtype=jnp.float32)
    y3 = my_layer_forward(x3, w_packed, b_packed)
    jax.block_until_ready(y3)
    assert y3.shape == x3.shape
    assert jnp.allclose(y3, ref_fn(x3), atol=1e-5, rtol=1e-5)

    print("KERNEL_OK")
</pallas_src>

<mosaic_0001>
module attributes {stable_mosaic.version = 11 : i64} {
  func.func @_packed_linear_kernel(%arg0: i32, %arg1: memref<8x128xf32, #tpu.memory_space<vmem>>, %arg2: memref<128x128xf32, #tpu.memory_space<vmem>>, %arg3: memref<1x128xf32, #tpu.memory_space<vmem>>, %arg4: memref<8x128xf32, #tpu.memory_space<vmem>>) attributes {dimension_semantics = [#tpu.dimension_semantics<parallel>], iteration_bounds = array<i64: 1>, scalar_prefetch = 0 : i64, scratch_operands = 0 : i64, tpu.core_type = #tpu.core_type<tc>, window_params = [{transform_indices = @transform_0, window_bounds = array<i64: 8, 128>}, {pipeline_mode = #tpu.pipeline_mode<synchronous>, transform_indices = @transform_1, window_bounds = array<i64: 128, 128>}, {pipeline_mode = #tpu.pipeline_mode<synchronous>, transform_indices = @transform_2, window_bounds = array<i64: 1, 128>}, {transform_indices = @transform_3, window_bounds = array<i64: 8, 128>}]} {
    %c0 = arith.constant 0 : index
    %c0_0 = arith.constant 0 : index
    %0 = vector.load %arg1[%c0, %c0_0] : memref<8x128xf32, #tpu.memory_space<vmem>>, vector<8x128xf32>
    %c0_1 = arith.constant 0 : index
    %c0_2 = arith.constant 0 : index
    %1 = vector.load %arg2[%c0_1, %c0_2] : memref<128x128xf32, #tpu.memory_space<vmem>>, vector<128x128xf32>
    %cst = arith.constant dense<0.000000e+00> : vector<8x128xf32>
    %2 = tpu.matmul %0, %1, %cst {dimension_numbers = #tpu.dot_dimension_numbers<[1], [0], [0], [1], [0, 0, 1, 1], [], []>, precision = #tpu.contract_precision<fp32>} : vector<8x128xf32>, vector<128x128xf32>, vector<8x128xf32> -> vector<8x128xf32>
    %c0_3 = arith.constant 0 : index
    %c0_4 = arith.constant 0 : index
    %3 = vector.load %arg3[%c0_3, %c0_4] : memref<1x128xf32, #tpu.memory_space<vmem>>, vector<1x128xf32>
    %4 = vector.broadcast %3 : vector<1x128xf32> to vector<8x128xf32>
    %5 = arith.addf %2, %4 : vector<8x128xf32>
    %c0_5 = arith.constant 0 : index
    %c0_6 = arith.constant 0 : index
    %6 = vector.load %arg4[%c0_5, %c0_6] : memref<8x128xf32, #tpu.memory_space<vmem>>, vector<8x128xf32>
    tpu.vector_store %arg4[%c0_5, %c0_6], %5 {strides = array<i32>} : memref<8x128xf32, #tpu.memory_space<vmem>>, vector<8x128xf32>,
    return
  }
  func.func @transform_0(%arg0: i32) -> (i32, i32) {
    %c0_i32 = arith.constant 0 : i32
    %c0_i32_0 = arith.constant 0 : i32
    return %arg0, %c0_i32 : i32, i32
  }
  func.func @transform_1(%arg0: i32) -> (i32, i32) {
    %c0_i32 = arith.constant 0 : i32
    %c0_i32_0 = arith.constant 0 : i32
    %c0_i32_1 = arith.constant 0 : i32
    return %c0_i32, %c0_i32_0 : i32, i32
  }
  func.func @transform_2(%arg0: i32) -> (i32, i32) {
    %c0_i32 = arith.constant 0 : i32
    %c0_i32_0 = arith.constant 0 : i32
    %c0_i32_1 = arith.constant 0 : i32
    return %c0_i32, %c0_i32_0 : i32, i32
  }
  func.func @transform_3(%arg0: i32) -> (i32, i32) {
    %c0_i32 = arith.constant 0 : i32
    %c0_i32_0 = arith.constant 0 : i32
    return %arg0, %c0_i32 : i32, i32
  }
}

</mosaic_0001>

<bundles_post_ra>
// kernel: my_layer_forward.1
= control target key start
LH: loop header
LB: loop body
LE: loop exit
PB: predicated region body
PF: predicated region fallthrough
CT: control target
= control target key end

     0   :  { %v1154_v0 = vmov 0.0|0.0   ;;  %vm1155_vm0 = vmmov 0   ;;  %v1156_v8 = vmov 0.0   ;;  %s1481_s1 = inlined_call_operand.vmem [shape: f32[128,128], index: 1, kind: input, shape index: {}]   ;;  %s1482_s0 = inlined_call_operand.vmem [shape: f32[8,128], index: 0, kind: input, shape index: {}]   ;;  %s1483_s2 = inlined_call_operand.vmem [shape: f32[1,128], index: 2, kind: input, shape index: {}]   ;;  %s1484_s3 = inlined_call_operand.vmem [shape: f32[8,128], index: 3, kind: output, shape index: {}]  }
   0x1   :  { %997 = vmatprep.subr.bf16.mxu1 %v1154_v0  ;;  %1069 = vmatprep.subr.bf16.mxu0 %v1154_v0  ;;  %v15_v1 = vld [vmem:[%s1481_s1] sm:$0xff]  ;;  %v16_v2 = vld [vmem:[%s1481_s1 + $0x8] sm:$0xff]  ;;  %v17_v3 = vld [vmem:[%s1481_s1 + $0x10] sm:$0xff] }
   0x2   :  { %v39_v4 = vand.u32 4294901760, %v15_v1  ;;  %v42_v5 = vand.u32 4294901760, %v16_v2  ;;  %v18_v6 = vld [vmem:[%s1481_s1 + $0x18] sm:$0xff]  ;;  %v45_v7 = vand.u32 4294901760, %v17_v3  ;;  %819 = vmatprep.mubr.msk.f32.mxu1 %vm1155_vm0, %v1156_v8  ;;  %924 = vmatprep.mubr.msk.f32.mxu0 %vm1155_vm0, %v1156_v8  ;;  %v19_v10 = vld [vmem:[%s1481_s1 + $0x20] sm:$0xff]  ;;  %v20_v11 = vld [vmem:[%s1481_s1 + $0x28] sm:$0xff] }
   0x3   :  { %v48_v9 = vand.u32 4294901760, %v18_v6  ;;  %v51_v14 = vand.u32 4294901760, %v19_v10  ;;  %v54_v15 = vand.u32 4294901760, %v20_v11  ;;  %v21_v16 = vld [vmem:[%s1481_s1 + $0x30] sm:$0xff]  ;;  %v22_v17 = vld [vmem:[%s1481_s1 + $0x38] sm:$0xff]  ;;  %v1224_v21 = vld [vmem:[%s1481_s1 + $0x40] sm:$0xff] }
   0x4   :  { %v1201_v12 = vpack.c.bf16 %v42_v5, %v39_v4  ;;  %v57_v19 = vand.u32 4294901760, %v21_v16  ;;  %v60_v20 = vand.u32 4294901760, %v22_v17  ;;  %v1229_v22 = vld [vmem:[%s1481_s1 + $0x48] sm:$0xff]  ;;  %v63_v24 = vand.u32 4294901760, %v1224_v21  ;;  %v14_v26 = vld [vmem:[%s1482_s0] sm:$0xff]  ;;  %v1245_v27 = vld [vmem:[%s1481_s1 + $0x50] sm:$0xff] }
   0x5   :  { %v1205_v13 = vpack.c.bf16 %v48_v9, %v45_v7  ;;  %v1217_v18 = vpack.c.bf16 %v54_v15, %v51_v14  ;;  %v66_v25 = vand.u32 4294901760, %v1229_v22  ;;  %v1250_v28 = vld [vmem:[%s1481_s1 + $0x58] sm:$0xff]  ;;  %v1252_v29 = vsub.f32 %v15_v1, %v39_v4  ;;  %v1267_v35 = vld [vmem:[%s1481_s1 + $0x60] sm:$0xff]  ;;  %v1274_v36 = vld [vmem:[%s1481_s1 + $0x68] sm:$0xff] }
   0x6   :  { %999 = vmatpush3.bf16.msra.mxu1 %v1201_v12  ;;  %1071 = vmatpush3.bf16.msra.mxu0 %v1201_v12  ;;  %v1233_v23 = vpack.c.bf16 %v60_v20, %v57_v19  ;;  %v1254_v30 = vand.u32 4294901760, %v14_v26  ;;  %v1256_v31 = vsub.f32 %v16_v2, %v42_v5  ;;  %v69_v33 = vand.u32 4294901760, %v1245_v27  ;;  %v1296_v43 = vld [vmem:[%s1481_s1 + $0x70] sm:$0xff]  ;;  %v1301_v44 = vld [vmem:[%s1481_s1 + $0x78] sm:$0xff] }
   0x7   :  { %1000 = vmatprep.subr.bf16.mxu1 %v1154_v0  ;;  %1072 = vmatprep.subr.bf16.mxu0 %v1154_v0  ;;  %v1260_v32 = vpack.c.bf16 %v66_v25, %v63_v24  ;;  %v72_v34 = vand.u32 4294901760, %v1250_v28  ;;  %v1276_v37 = vsub.f32 %v17_v3, %v45_v7  ;;  %v1278_v38 = vsub.f32 %v18_v6, %v48_v9 }
   0x8   :  { %v75_v39 = vand.u32 4294901760, %v1267_v35  ;;  %v1282_v40 = vsub.f32 %v14_v26, %v1254_v30  ;;  %v78_v42 = vand.u32 4294901760, %v1274_v36  ;;  %v132_v45 = vand.u32 4294901760, %v1252_v29 }
   0x9   :  { %v1290_v41 = vpack.c.bf16 %v72_v34, %v69_v33  ;;  %v139_v46 = vand.u32 4294901760, %v1256_v31  ;;  %v1307_v47 = vsub.f32 %v19_v10, %v51_v14  ;;  %v1309_v48 = vsub.f32 %v20_v11, %v54_v15 }
   0xa   :  { %1002 = vmatpush3.bf16.msra.mxu1 %v1205_v13  ;;  %1074 = vmatpush3.bf16.msra.mxu0 %v1205_v13  ;;  %v81_v49 = vand.u32 4294901760, %v1296_v43  ;;  %v84_v50 = vand.u32 4294901760, %v1301_v44  ;;  %v121_v51 = vand.u32 4294901760, %v1282_v40  ;;  %v146_v52 = vand.u32 4294901760, %v1276_v37 }
   0xb   :  { %1003 = vmatprep.subr.bf16.mxu1 %v1154_v0  ;;  %1075 = vmatprep.subr.bf16.mxu0 %v1154_v0  ;;  %v1321_v53 = vpack.c.bf16 %v78_v42, %v75_v39  ;;  %v133_v54 = vsub.f32 %v1252_v29, %v132_v45  ;;  %v140_v55 = vsub.f32 %v1256_v31, %v139_v46  ;;  %v153_v56 = vand.u32 4294901760, %v1278_v38 }
   0xc   :  { %v1328_v57 = vsub.f32 %v21_v16, %v57_v19  ;;  %v1330_v58 = vsub.f32 %v22_v17, %v60_v20  ;;  %v122_v59 = vsub.f32 %v1282_v40, %v121_v51  ;;  %v147_v60 = vsub.f32 %v1276_v37, %v146_v52 }
   0xd   :  { %v160_v61 = vand.u32 4294901760, %v1307_v47  ;;  %v167_v62 = vand.u32 4294901760, %v1309_v48  ;;  %v1342_v63 = vpack.c.bf16 %v84_v50, %v81_v49  ;;  %v134_v1 = vand.u32 4294901760, %v133_v54 }
   0xe   :  { %1005 = vmatpush3.bf16.msra.mxu1 %v1217_v18  ;;  %1077 = vmatpush3.bf16.msra.mxu0 %v1217_v18  ;;  %v141_v2 = vand.u32 4294901760, %v140_v55  ;;  %v154_v3 = vsub.f32 %v1278_v38, %v153_v56  ;;  %v1348_v4 = vsub.f32 %v1224_v21, %v63_v24  ;;  %v1351_v5 = vsub.f32 %v1229_v22, %v66_v25 }
   0xf   :  { %1006 = vmatprep.subr.bf16.mxu1 %v1154_v0  ;;  %1078 = vmatprep.subr.bf16.mxu0 %v1154_v0  ;;  %v1094_v6 = vpack.c.bf16 %v139_v46, %v132_v45  ;;  %v123_v7 = vand.u32 4294901760, %v122_v59  ;;  %v148_v9 = vand.u32 4294901760, %v147_v60  ;;  %v161_v10 = vsub.f32 %v1307_v47, %v160_v61 }
  0x10   :  { %v168_v11 = vsub.f32 %v1309_v48, %v167_v62  ;;  %v1022_v14 = vpack.c.bf16 %v141_v2, %v134_v1  ;;  %v155_v15 = vand.u32 4294901760, %v154_v3  ;;  %v174_v16 = vand.u32 4294901760, %v1328_v57 }
  0x11   :  { %v181_v17 = vand.u32 4294901760, %v1330_v58  ;;  %v1364_v19 = vsub.f32 %v1245_v27, %v69_v33  ;;  %v1369_v20 = vsub.f32 %v1250_v28, %v72_v34  ;;  %v1097_v21 = vpack.c.bf16 %v153_v56, %v146_v52 }
  0x12   :  { %1008 = vmatpush3.bf16.msra.mxu1 %v1233_v23  ;;  %1080 = vmatpush3.bf16.msra.mxu0 %v1233_v23  ;;  %v162_v22 = vand.u32 4294901760, %v161_v10  ;;  %v169_v24 = vand.u32 4294901760, %v168_v11  ;;  %v188_v25 = vand.u32 4294901760, %v1348_v4  ;;  %v1025_v26 = vpack.c.bf16 %v155_v15, %v148_v9 }
  0x13   :  { %1009 = vmatprep.subr.bf16.mxu1 %v1154_v0  ;;  %1081 = vmatprep.subr.bf16.mxu0 %v1154_v0  ;;  %v175_v45 = vsub.f32 %v1328_v57, %v174_v16  ;;  %v182_v27 = vsub.f32 %v1330_v58, %v181_v17  ;;  %v195_v33 = vand.u32 4294901760, %v1351_v5  ;;  %v1380_v28 = vsub.f32 %v1267_v35, %v75_v39 }
  0x14   :  { %v1385_v34 = vsub.f32 %v1274_v36, %v78_v42  ;;  %v1028_v46 = vpack.c.bf16 %v169_v24, %v162_v22  ;;  %v189_v52 = vsub.f32 %v1348_v4, %v188_v25  ;;  %v202_v54 = vand.u32 4294901760, %v1364_v19 }
  0x15   :  { %v176_v35 = vand.u32 4294901760, %v175_v45  ;;  %v183_v39 = vand.u32 4294901760, %v182_v27  ;;  %v196_v55 = vsub.f32 %v1351_v5, %v195_v33  ;;  %v209_v36 = vand.u32 4294901760, %v1369_v20 }
  0x16   :  { %1011 = vmatpush3.bf16.msra.mxu1 %v1260_v32  ;;  %1083 = vmatpush3.bf16.msra.mxu0 %v1260_v32  ;;  %v1400_v42 = vsub.f32 %v1296_v43, %v81_v49  ;;  %v1405_v56 = vsub.f32 %v1301_v44, %v84_v50  ;;  %v1103_v59 = vpack.c.bf16 %v181_v17, %v174_v16  ;;  %v190_v60 = vand.u32 4294901760, %v189_v52 }
  0x17   :  { %1012 = vmatprep.subr.bf16.mxu1 %v1154_v0  ;;  %1084 = vmatprep.subr.bf16.mxu0 %v1154_v0  ;;  %v1031_v1 = vpack.c.bf16 %v183_v39, %v176_v35  ;;  %v197_v2 = vand.u32 4294901760, %v196_v55  ;;  %v210_v3 = vsub.f32 %v1369_v20, %v209_v36  ;;  %v223_v43 = vand.u32 4294901760, %v1385_v34 }
  0x18   :  { %v1106_v44 = vpack.c.bf16 %v195_v33, %v188_v25  ;;  %v237_v11 = vand.u32 4294901760, %v1405_v56 }
  0x19   :  { %v211_v9 = vand.u32 4294901760, %v210_v3  ;;  %v224_v10 = vsub.f32 %v1385_v34, %v223_v43 }
  0x1a   :  { %1014 = vmatpush3.bf16.msra.mxu1 %v1290_v41  ;;  %1086 = vmatpush3.bf16.msra.mxu0 %v1290_v41  ;;  %v238_v22 = vsub.f32 %v1405_v56, %v237_v11 }
  0x1b   :  { %1015 = vmatprep.subr.bf16.mxu1 %v1154_v0  ;;  %1087 = vmatprep.subr.bf16.mxu0 %v1154_v0  ;;  %v225_v17 = vand.u32 4294901760, %v224_v10 }
  0x1c   :  { %v239_v45 = vand.u32 4294901760, %v238_v22 }
  0x1e   :  { %1017 = vmatpush3.bf16.msra.mxu1 %v1321_v53  ;;  %1089 = vmatpush3.bf16.msra.mxu0 %v1321_v53 }
  0x1f   :  { %1018 = vmatprep.subr.bf16.mxu1 %v1154_v0  ;;  %1090 = vmatprep.subr.bf16.mxu0 %v1154_v0 }
  0x22   :  { %1020 = vmatpush3.bf16.msra.mxu1 %v1342_v63  ;;  %1092 = vmatpush3.bf16.msra.mxu0 %v1342_v63 }
  0x23   :  { %1021 = vmatprep.subr.bf16.mxu1 %v1154_v0  ;;  %1093 = vmatprep.subr.bf16.mxu0 %v1154_v0 }
  0x25   :  { %820 = vmatmul.mubr.f32.vlgmr.msra.gmra.mrb[0].mxu1 %v123_v7  ;;  %925 = vmatmul.mubr.f32.vlgmr.msra.gmra.mrb[0].mxu0 %v121_v51  ;;  %v1100_v51 = vpack.c.bf16 %v167_v62, %v160_v61  ;;  %v203_v61 = vsub.f32 %v1364_v19, %v202_v54  ;;  %v216_v62 = vand.u32 4294901760, %v1380_v28  ;;  %v1034_v7 = vpack.c.bf16 %v197_v2, %v190_v60 }
  0x26   :  { %1023 = vmatpush3.bf16.msra.mxu1 %v1022_v14  ;;  %1095 = vmatpush3.bf16.msra.mxu0 %v1094_v6  ;;  %v230_v6 = vand.u32 4294901760, %v1400_v42  ;;  %v1109_v14 = vpack.c.bf16 %v209_v36, %v202_v54 }
  0x27   :  { %1024 = vmatprep.subr.bf16.mxu1 %v1154_v0  ;;  %1096 = vmatprep.subr.bf16.mxu0 %v1154_v0  ;;  %v204_v49 = vand.u32 4294901760, %v203_v61  ;;  %v217_v50 = vsub.f32 %v1380_v28, %v216_v62  ;;  %v1112_v25 = vpack.c.bf16 %v223_v43, %v216_v62 }
  0x28   :  { %854 = vmatprep.mubr.msk.f32.mxu1 %vm1155_vm0, %v1156_v8  ;;  %959 = vmatprep.mubr.msk.f32.mxu0 %vm1155_vm0, %v1156_v8  ;;  %v1115_v33 = vpack.c.bf16 %v237_v11, %v230_v6 }
  0x29   :  { %v218_v15 = vand.u32 4294901760, %v217_v50  ;;  %v1037_v16 = vpack.c.bf16 %v211_v9, %v204_v49 }
  0x2a   :  { %1026 = vmatpush3.bf16.msra.mxu1 %v1025_v26  ;;  %1098 = vmatpush3.bf16.msra.mxu0 %v1097_v21  ;;  %v231_v21 = vsub.f32 %v1400_v42, %v230_v6 }
  0x2b   :  { %1027 = vmatprep.subr.bf16.mxu1 %v1154_v0  ;;  %1099 = vmatprep.subr.bf16.mxu0 %v1154_v0  ;;  %v1040_v24 = vpack.c.bf16 %v225_v17, %v218_v15 }
  0x2c   :  { %v232_v26 = vand.u32 4294901760, %v231_v21 }
  0x2e   :  { %1029 = vmatpush3.bf16.msra.mxu1 %v1028_v46  ;;  %1101 = vmatpush3.bf16.msra.mxu0 %v1100_v51  ;;  %v1043_v27 = vpack.c.bf16 %v239_v45, %v232_v26  ;;  %v1046_v46 = vpack.c.bf16 %v1256_v31, %v1252_v29  ;;  %v1049_v51 = vpack.c.bf16 %v1278_v38, %v1276_v37  ;;  %v684_v31 = vld [vmem:[%s1483_s2] ss:$0 sm:$0xff] }
  0x2f   :  { %1030 = vmatprep.subr.bf16.mxu1 %v1154_v0  ;;  %1102 = vmatprep.subr.bf16.mxu0 %v1154_v0  ;;  %v1052_v29 = vpack.c.bf16 %v1309_v48, %v1307_v47 }
  0x32   :  { %1032 = vmatpush3.bf16.msra.mxu1 %v1031_v1  ;;  %1104 = vmatpush3.bf16.msra.mxu0 %v1103_v59 }
  0x33   :  { %1033 = vmatprep.subr.bf16.mxu1 %v1154_v0  ;;  %1105 = vmatprep.subr.bf16.mxu0 %v1154_v0 }
  0x36   :  { %1035 = vmatpush3.bf16.msra.mxu1 %v1034_v7  ;;  %1107 = vmatpush3.bf16.msra.mxu0 %v1106_v44 }
  0x37   :  { %1036 = vmatprep.subr.bf16.mxu1 %v1154_v0  ;;  %1108 = vmatprep.subr.bf16.mxu0 %v1154_v0 }
  0x3a   :  { %1038 = vmatpush3.bf16.msra.mxu1 %v1037_v16  ;;  %1110 = vmatpush3.bf16.msra.mxu0 %v1109_v14 }
  0x3b   :  { %1039 = vmatprep.subr.bf16.mxu1 %v1154_v0  ;;  %1111 = vmatprep.subr.bf16.mxu0 %v1154_v0 }
  0x3e   :  { %1041 = vmatpush3.bf16.msra.mxu1 %v1040_v24  ;;  %1113 = vmatpush3.bf16.msra.mxu0 %v1112_v25 }
  0x3f   :  { %1042 = vmatprep.subr.bf16.mxu1 %v1154_v0  ;;  %1114 = vmatprep.subr.bf16.mxu0 %v1154_v0 }
  0x42   :  { %1044 = vmatpush3.bf16.msra.mxu1 %v1043_v27  ;;  %1116 = vmatpush3.bf16.msra.mxu0 %v1115_v33 }
  0x43   :  { %1045 = vmatprep.subr.bf16.mxu1 %v1154_v0  ;;  %1117 = vmatprep.subr.bf16.mxu0 %v1154_v0 }
  0x45   :  { %855 = vmatmul.mubr.f32.vlgmr.msra.gmra.mrb[0].mxu1 %v1254_v30  ;;  %960 = vmatmul.mubr.f32.vlgmr.msra.gmra.mrb[0].mxu0 %v1254_v30 }
  0x46   :  { %1047 = vmatpush3.bf16.msra.mxu1 %v1046_v46  ;;  %1119 = vmatpush3.bf16.msra.mxu0 %v1201_v12  ;;  %v1055_v12 = vpack.c.bf16 %v1330_v58, %v1328_v57 }
  0x47   :  { %1048 = vmatprep.subr.bf16.mxu1 %v1154_v0  ;;  %1120 = vmatprep.subr.bf16.mxu0 %v1154_v0 }
  0x48   :  { %889 = vmatprep.mubr.msk.f32.mxu1 %vm1155_vm0, %v1156_v8  ;;  %994 = vmatprep.mubr.msk.f32.mxu0 %vm1155_vm0, %v1156_v8  ;;  %v1058_v8 = vpack.c.bf16 %v1351_v5, %v1348_v4 }
  0x4a   :  { %1050 = vmatpush3.bf16.msra.mxu1 %v1049_v51  ;;  %1122 = vmatpush3.bf16.msra.mxu0 %v1205_v13  ;;  %v1061_v13 = vpack.c.bf16 %v1369_v20, %v1364_v19 }
  0x4b   :  { %1051 = vmatprep.subr.bf16.mxu1 %v1154_v0  ;;  %1123 = vmatprep.subr.bf16.mxu0 %v1154_v0 }
  0x4e   :  { %1053 = vmatpush3.bf16.msra.mxu1 %v1052_v29  ;;  %1125 = vmatpush3.bf16.msra.mxu0 %v1217_v18  ;;  %v1064_v18 = vpack.c.bf16 %v1385_v34, %v1380_v28 }
  0x4f   :  { %1054 = vmatprep.subr.bf16.mxu1 %v1154_v0  ;;  %1126 = vmatprep.subr.bf16.mxu0 %v1154_v0 }
  0x52   :  { %1056 = vmatpush3.bf16.msra.mxu1 %v1055_v12  ;;  %1128 = vmatpush3.bf16.msra.mxu0 %v1233_v23  ;;  %v1067_v23 = vpack.c.bf16 %v1405_v56, %v1400_v42 }
  0x53   :  { %1057 = vmatprep.subr.bf16.mxu1 %v1154_v0  ;;  %1129 = vmatprep.subr.bf16.mxu0 %v1154_v0 }
  0x56   :  { %1059 = vmatpush3.bf16.msra.mxu1 %v1058_v8  ;;  %1131 = vmatpush3.bf16.msra.mxu0 %v1260_v32 }
  0x57   :  { %1060 = vmatprep.subr.bf16.mxu1 %v1154_v0  ;;  %1132 = vmatprep.subr.bf16.mxu0 %v1154_v0 }
  0x5a   :  { %1062 = vmatpush3.bf16.msra.mxu1 %v1061_v13  ;;  %1134 = vmatpush3.bf16.msra.mxu0 %v1290_v41 }
  0x5b   :  { %1063 = vmatprep.subr.bf16.mxu1 %v1154_v0  ;;  %1135 = vmatprep.subr.bf16.mxu0 %v1154_v0 }
  0x5e   :  { %1065 = vmatpush3.bf16.msra.mxu1 %v1064_v18  ;;  %1137 = vmatpush3.bf16.msra.mxu0 %v1321_v53 }
  0x5f   :  { %1066 = vmatprep.subr.bf16.mxu1 %v1154_v0  ;;  %1138 = vmatprep.subr.bf16.mxu0 %v1154_v0 }
  0x62   :  { %1068 = vmatpush3.bf16.msra.mxu1 %v1067_v23  ;;  %1140 = vmatpush3.bf16.msra.mxu0 %v1342_v63 }
  0x65   :  { %890 = vmatmul.mubr.f32.vlgmr.msra.gmra.mrb[0].mxu1 %v1282_v40  ;;  %995 = vmatmul.mubr.f32.vlgmr.msra.gmra.mrb[0].mxu0 %v1254_v30 }
 0x138   :  { %v380_v32 = vpop.f32.mrb[0].mxu1  ;;  %v675_v37 = vpop.f32.mrb[0].mxu0 }
 0x139   :  { %v1141_v38 = vadd.f32 %v684_v31, %v380_v32  ;;  %v891_v41 = vpop.f32.mrb[1].mxu1  ;;  %v996_v47 = vpop.f32.mrb[1].mxu0 }
 0x13b   :  { %v1142_v48 = vadd.f32 %v1141_v38, %v675_v37 }
 0x13d   :  { %679 = vst [vmem:[%s1484_s3] sm:$0xff] %v1142_v48 }

</bundles_post_ra>
